<compile_context>
chip_gen: v7x
topology: tpu7x:2x2x1
jax: 0.10.0
libtpu: 0.0.40
codegen_flags: <defaults>
</compile_context>

<pallas_src>
import functools

import jax
import jax.numpy as jnp
from jax import lax
from jax.experimental import pallas as pl
from jax.experimental.pallas import tpu as pltpu

PAD_ID = 0  # ignore_index default of the torch module


def _round_up(x, m):
    return (x + m - 1) // m * m


def _sublane(itemsize):
    # minimum second-to-last tile dim for this dtype: 8 f32, 16 bf16, 32 int8
    return max(8, 32 // int(itemsize))


def _vmem_limit_bytes():
    """Generation-aware scoped-VMEM request (v5e/v6e: 128 MiB, v7x: 64 MiB)."""
    cap = 64 * 1024 * 1024  # conservative fallback (v7x per-TensorCore)
    try:
        info = pltpu.get_tpu_info()
        c = int(getattr(info, "vmem_capacity_bytes", 0) or 0)
        if c > 0:
            cap = c
    except Exception:
        pass
    if cap >= 100 * 1024 * 1024:            # 128-MiB parts (v5e / v6e)
        return 96 * 1024 * 1024
    return max(32 * 1024 * 1024,            # 64-MiB parts (v7x) and smaller
               min(cap - 12 * 1024 * 1024, 52 * 1024 * 1024))


def _pick_row_tile(n_rows, v, in_itemsize, reduction, vmem_limit):
    """Row tile sized from the real VMEM footprint (dtype & generation aware)."""
    sub = _sublane(in_itemsize)
    if n_rows <= sub:
        return n_rows                        # full-dim block (always legal)
    v_lanes = _round_up(v, 128)              # physical lane footprint per row
    per_row = 2 * v_lanes * in_itemsize      # double-buffered input block
    if reduction == 'none':
        per_row += 2 * v_lanes * in_itemsize # double-buffered output block
    per_row += 4 * v_lanes * 4               # f32 elementwise temporaries
    # TODO(synk): for very large vocabs (per_row ~MBs) an in-kernel vocab-chunk
    # fori_loop would bound the temporaries and let row_tile grow further.
    budget = (vmem_limit * 3) // 4           # headroom for Mosaic scratch
    tile = budget // max(per_row, 1)
    tile = max(sub, min(2048, (tile // sub) * sub))
    tile = min(tile, _round_up(n_rows, sub))
    return tile


def _ce_full_kernel(logp_ref, tgt_ref, loss_ref, *, smoothing, ignore_index,
                    n_rows, row_tile):
    """reduction='none': materialize the (row_tile, V) loss tile."""
    i = pl.program_id(0)
    lp = logp_ref[...].astype(jnp.float32)                  # in-kernel cast
    tgt = tgt_ref[...]                                      # (TN, 1) int32
    tn, v = lp.shape

    finite = jnp.isfinite(lp)
    lp_clean = jnp.where(finite, lp, jnp.float32(0.0))

    n_cls = jnp.sum(jnp.where(finite, jnp.float32(1.0), jnp.float32(0.0)),
                    axis=-1, keepdims=True)
    smooth_prob = jnp.float32(smoothing) / jnp.maximum(n_cls, jnp.float32(1.0))

    col = lax.broadcasted_iota(jnp.int32, (tn, v), 1)
    onehot = col == tgt

    # Partial last tile: rows past n_rows are garbage -> treat as ignored
    # (their writeback is clipped anyway).
    row = lax.broadcasted_iota(jnp.int32, (tn, 1), 0)
    drop = (tgt == ignore_index) | ((i * row_tile + row) >= n_rows)

    smoothed = jnp.where(finite, smooth_prob, jnp.float32(0.0))
    smoothed = jnp.where(onehot, jnp.float32(1.0 - smoothing), smoothed)
    smoothed = jnp.where(drop, jnp.float32(0.0), smoothed)

    loss_ref[...] = (-smoothed * lp_clean).astype(loss_ref.dtype)


def _ce_reduce_kernel(logp_ref, tgt_ref, acc_ref, *, smoothing, ignore_index,
                      n_rows, row_tile, tiles_per_split):
    """reduction='sum'/'mean': per-row algebraic reduction, in-kernel accum.

    Output block (8,128) stays resident across the inner ("arbitrary") grid
    axis; [0,0] accumulates the loss sum, [0,1] the not-ignored row count.
    """
    split = pl.program_id(0)
    inner = pl.program_id(1)

    @pl.when(inner == 0)
    def _():
        acc_ref[...] = jnp.zeros_like(acc_ref)

    lp = logp_ref[...].astype(jnp.float32)                  # (TN, V)
    tgt = tgt_ref[...]                                      # (TN, 1) int32
    tn, v = lp.shape

    finite = jnp.isfinite(lp)
    lp_clean = jnp.where(finite, lp, jnp.float32(0.0))

    col = lax.broadcasted_iota(jnp.int32, (tn, v), 1)
    onehot = col == tgt

    # Per-row reductions over the vocab axis (XLU).
    # TODO(synk): on v7x, s_row / n_cls could be offloaded to the idle MXU
    # (x @ ones) if bundle dumps show the VALU slot binding for bf16 inputs.
    n_cls = jnp.sum(jnp.where(finite, jnp.float32(1.0), jnp.float32(0.0)),
                    axis=-1, keepdims=True)
    s_row = jnp.sum(lp_clean, axis=-1, keepdims=True)
    t_row = jnp.sum(jnp.where(onehot, lp_clean, jnp.float32(0.0)),
                    axis=-1, keepdims=True)                 # lp_clean[r, tgt[r]]

    smooth_prob = jnp.float32(smoothing) / jnp.maximum(n_cls, jnp.float32(1.0))
    rowsum = -(smooth_prob * (s_row - t_row)
               + jnp.float32(1.0 - smoothing) * t_row)      # (TN, 1)

    # Partial last tile: garbage rows only pollute their own per-row values
    # (all reductions above run along V only), so masking the per-row result
    # before the cross-row sum is sufficient and cheaper than per-element.
    row = lax.broadcasted_iota(jnp.int32, (tn, 1), 0)
    gid = (split * tiles_per_split + inner) * row_tile
    keep = ((gid + row) < n_rows) & (tgt != ignore_index)
    rowsum = jnp.where(keep, rowsum, jnp.float32(0.0))

    tile_sum = jnp.sum(rowsum)
    tile_cnt = jnp.sum(jnp.where(keep, jnp.float32(1.0), jnp.float32(0.0)))

    r = lax.broadcasted_iota(jnp.int32, acc_ref.shape, 0)
    c = lax.broadcasted_iota(jnp.int32, acc_ref.shape, 1)
    upd = jnp.where((r == 0) & (c == 0), tile_sum,
                    jnp.where((r == 0) & (c == 1), tile_cnt, jnp.float32(0.0)))
    acc_ref[...] += upd


def smoothed_cross_entropy_loss(logp, target, smoothing,
                                ignore_index=PAD_ID, reduction='mean',
                                row_tile=None, loss_dtype=None):
    """JAX/Pallas equivalent of SmoothedCrossEntropyLoss.forward."""
    assert 0.0 < smoothing < 1.0, 'Smoothing factor should be in (0.0, 1.0)'
    assert reduction in {'mean', 'sum', 'none'}
    assert (target.shape == logp.shape[:target.ndim]
            and target.ndim + 1 == logp.ndim)

    V = logp.shape[-1]
    logp2 = logp.reshape(-1, V)              # no padding / dtype cast in HBM
    tgt2 = target.reshape(-1, 1).astype(jnp.int32)
    N = logp2.shape[0]

    in_itemsize = logp2.dtype.itemsize
    sub = _sublane(in_itemsize)
    vmem_limit = _vmem_limit_bytes()

    if row_tile is None:
        row_tile = _pick_row_tile(N, V, in_itemsize, reduction, vmem_limit)
    elif N <= sub:
        row_tile = N
    else:
        row_tile = max(sub, min(_round_up(int(row_tile), sub),
                                _round_up(N, sub)))

    cparams_1d = pltpu.CompilerParams(
        dimension_semantics=("parallel",), vmem_limit_bytes=vmem_limit)

    if reduction == 'none':
        out_dtype = logp2.dtype if loss_dtype is None else loss_dtype
        num_tiles = pl.cdiv(N, row_tile)
        kernel = functools.partial(
            _ce_full_kernel, smoothing=float(smoothing),
            ignore_index=int(ignore_index), n_rows=N, row_tile=row_tile)
        return pl.pallas_call(
            kernel,
            out_shape=jax.ShapeDtypeStruct((N, V), out_dtype),
            grid_spec=pltpu.PrefetchScalarGridSpec(
                num_scalar_prefetch=0,
                grid=(num_tiles,),
                in_specs=[
                    pl.BlockSpec((row_tile, V), lambda i: (i, 0)),
                    # TODO(synk): target could be a one-shot SMEM scalar
                    # prefetch; per-step DMA overhead here is sub-percent.
                    pl.BlockSpec((row_tile, 1), lambda i: (i, 0)),
                ],
                out_specs=pl.BlockSpec((row_tile, V), lambda i: (i, 0)),
            ),
            compiler_params=cparams_1d,
        )(logp2, tgt2)

    # reduction in {'sum', 'mean'}: in-kernel accumulation, tiny HBM output.
    total_tiles = pl.cdiv(N, row_tile)
    if total_tiles > 1 and total_tiles % 2 == 1:
        # Nudge the tile size so the tile count is even and the leading grid
        # axis can shard across v7x's two TensorCores (wrapper-side only, so
        # every index_map stays affine and in-bounds).
        rt = row_tile
        while rt > sub and pl.cdiv(N, rt) % 2 == 1:
            rt -= sub
        if pl.cdiv(N, rt) % 2 == 0:
            row_tile, total_tiles = rt, pl.cdiv(N, rt)
    n_splits = 2 if (total_tiles > 1 and total_tiles % 2 == 0) else 1
    tps = total_tiles // n_splits

    kernel = functools.partial(
        _ce_reduce_kernel, smoothing=float(smoothing),
        ignore_index=int(ignore_index), n_rows=N, row_tile=row_tile,
        tiles_per_split=tps)
    partials = pl.pallas_call(
        kernel,
        out_shape=jax.ShapeDtypeStruct((n_splits * 8, 128), jnp.float32),
        grid_spec=pltpu.PrefetchScalarGridSpec(
            num_scalar_prefetch=0,
            grid=(n_splits, tps),
            in_specs=[
                pl.BlockSpec((row_tile, V), lambda i, j: (i * tps + j, 0)),
                pl.BlockSpec((row_tile, 1), lambda i, j: (i * tps + j, 0)),
            ],
            out_specs=pl.BlockSpec((8, 128), lambda i, j: (i, 0)),
        ),
        compiler_params=pltpu.CompilerParams(
            dimension_semantics=("parallel", "arbitrary"),
            vmem_limit_bytes=vmem_limit),
    )(logp2, tgt2)

    total = jnp.sum(partials[:, 0])
    if reduction == 'sum':
        return total
    count = jnp.sum(partials[:, 1])
    # NOTE: matches torch — if every target equals ignore_index this is 0/0.
    return total / count


def _reference(logp, target, smoothing, ignore_index, reduction):
    """Pure-JAX reference mirroring the torch row-loop semantics."""
    V = logp.shape[-1]
    lp = logp.reshape(-1, V).astype(jnp.float32)
    tgt = target.reshape(-1).astype(jnp.int32)
    finite = jnp.isfinite(lp)
    n_cls = jnp.sum(finite, axis=-1, keepdims=True).astype(jnp.float32)
    smooth = jnp.where(finite, smoothing / jnp.maximum(n_cls, 1.0), 0.0)
    onehot = jnp.arange(V)[None, :] == tgt[:, None]
    smooth = jnp.where(onehot, 1.0 - smoothing, smooth)
    smooth = jnp.where((tgt == ignore_index)[:, None], 0.0, smooth)
    loss = -smooth * jnp.where(finite, lp, 0.0)
    if reduction == 'none':
        return loss
    if reduction == 'sum':
        return jnp.sum(loss)
    cnt = jnp.sum((tgt != ignore_index).astype(jnp.float32))
    return jnp.sum(jnp.sum(loss, axis=-1)) / cnt


if __name__ == "__main__":
    import numpy as np

    key = jax.random.PRNGKey(0)
    # V deliberately not a multiple of 128 to exercise the unpadded lane path.
    B, S, V = 2, 8, 100
    k1, k2 = jax.random.split(key)

    logits = jax.random.normal(k1, (B, S, V), dtype=jnp.float32)
    logp = jax.nn.log_softmax(logits, axis=-1)
    # non-finite entries (masked vocab positions + a NaN)
    logp = logp.at[:, :, 5:9].set(-jnp.inf)
    logp = logp.at[0, 2, 20].set(jnp.nan)

    target = jax.random.randint(k2, (B, S), 0, V, dtype=jnp.int32)
    target = target.at[0, 0].set(PAD_ID)   # ignored rows
    target = target.at[1, 3].set(PAD_ID)
    target = target.at[0, 1].set(6)        # target on a non-finite column

    smoothing = 0.1

    out_mean = smoothed_cross_entropy_loss(logp, target, smoothing,
                                           reduction='mean')
    out_sum = smoothed_cross_entropy_loss(logp, target, smoothing,
                                          reduction='sum')
    out_none = smoothed_cross_entropy_loss(logp, target, smoothing,
                                           reduction='none')
    # bf16 input exercises the in-kernel dtype cast + 16-sublane tiling path
    logp_bf16 = logp.astype(jnp.bfloat16)
    out_sum_bf16 = smoothed_cross_entropy_loss(logp_bf16, target, smoothing,
                                               reduction='sum')
    jax.block_until_ready((out_mean, out_sum, out_none, out_sum_bf16))

    # silent correctness checks against the pure-JAX reference
    np.testing.assert_allclose(
        np.asarray(out_mean),
        np.asarray(_reference(logp, target, smoothing, PAD_ID, 'mean')),
        rtol=5e-3, atol=1e-6)
    np.testing.assert_allclose(
        np.asarray(out_sum),
        np.asarray(_reference(logp, target, smoothing, PAD_ID, 'sum')),
        rtol=5e-3, atol=1e-6)
    np.testing.assert_allclose(
        np.asarray(out_none),
        np.asarray(_reference(logp, target, smoothing, PAD_ID, 'none')),
        rtol=5e-3, atol=1e-6)
    np.testing.assert_allclose(
        np.asarray(out_sum_bf16),
        np.asarray(_reference(logp_bf16.astype(jnp.float32), target,
                              smoothing, PAD_ID, 'sum')),
        rtol=5e-3, atol=1e-6)

    print("KERNEL_OK")
</pallas_src>

<mosaic_0001>
module attributes {stable_mosaic.version = 11 : i64} {
  func.func @_ce_reduce_kernel(%arg0: i32, %arg1: i32, %arg2: memref<16x100xf32, #tpu.memory_space<vmem>>, %arg3: memref<16x1xi32, #tpu.memory_space<vmem>>, %arg4: memref<8x128xf32, #tpu.memory_space<vmem>>) attributes {dimension_semantics = [#tpu.dimension_semantics<parallel>, #tpu.dimension_semantics<arbitrary>], iteration_bounds = array<i64: 1, 1>, scalar_prefetch = 0 : i64, scratch_operands = 0 : i64, tpu.core_type = #tpu.core_type<tc>, window_params = [{transform_indices = @transform_0, window_bounds = array<i64: 16, 100>}, {transform_indices = @transform_1, window_bounds = array<i64: 16, 1>}, {transform_indices = @transform_2, window_bounds = array<i64: 8, 128>}]} {
    %c0_i32 = arith.constant 0 : i32
    %0 = arith.cmpi eq, %arg1, %c0_i32 : i32
    %1 = arith.extui %0 : i1 to i32
    %c0_i32_0 = arith.constant 0 : i32
    %2 = arith.cmpi ne, %1, %c0_i32_0 : i32
    scf.if %2 {
      %cst_31 = arith.constant 0.000000e+00 : f32
      %78 = vector.broadcast %cst_31 : f32 to vector<8x128xf32>
      %c0_32 = arith.constant 0 : index
      %c0_33 = arith.constant 0 : index
      %79 = vector.load %arg4[%c0_32, %c0_33] : memref<8x128xf32, #tpu.memory_space<vmem>>, vector<8x128xf32>
      tpu.vector_store %arg4[%c0_32, %c0_33], %78 {strides = array<i32>} : memref<8x128xf32, #tpu.memory_space<vmem>>, vector<8x128xf32>,
    } else {
    }
    %c0 = arith.constant 0 : index
    %c0_1 = arith.constant 0 : index
    %3 = vector.load %arg2[%c0, %c0_1] : memref<16x100xf32, #tpu.memory_space<vmem>>, vector<16x100xf32>
    %c0_2 = arith.constant 0 : index
    %c0_3 = arith.constant 0 : index
    %4 = vector.load %arg3[%c0_2, %c0_3] : memref<16x1xi32, #tpu.memory_space<vmem>>, vector<16x1xi32>
    %5 = tpu.weird %3 : vector<16x100xf32> -> vector<16x100xi1>
    %cst = arith.constant dense<true> : vector<16x100xi1>
    %6 = arith.xori %5, %cst : vector<16x100xi1>
    %cst_4 = arith.constant 0.000000e+00 : f32
    %7 = vector.broadcast %cst_4 : f32 to vector<16x100xf32>
    %8 = arith.select %6, %3, %7 : vector<16x100xi1>, vector<16x100xf32>
    %9 = tpu.iota {dimensions = array<i32: 1>} : vector<16x100xi32>
    %10 = vector.broadcast %4 : vector<16x1xi32> to vector<16x100xi32>
    %11 = arith.cmpi eq, %9, %10 : vector<16x100xi32>
    %cst_5 = arith.constant 1.000000e+00 : f32
    %cst_6 = arith.constant 0.000000e+00 : f32
    %12 = vector.broadcast %cst_5 : f32 to vector<16x100xf32>
    %13 = vector.broadcast %cst_6 : f32 to vector<16x100xf32>
    %14 = arith.select %6, %12, %13 : vector<16x100xi1>, vector<16x100xf32>
    %cst_7 = arith.constant dense<0.000000e+00> : vector<16xf32>
    %15 = vector.multi_reduction <add>, %14, %cst_7 [1] : vector<16x100xf32> to vector<16xf32>
    %16 = vector.shape_cast %15 : vector<16xf32> to vector<16x1xf32>
    %cst_8 = arith.constant dense<0.000000e+00> : vector<16xf32>
    %17 = vector.multi_reduction <add>, %8, %cst_8 [1] : vector<16x100xf32> to vector<16xf32>
    %18 = vector.shape_cast %17 : vector<16xf32> to vector<16x1xf32>
    %cst_9 = arith.constant 0.000000e+00 : f32
    %19 = vector.broadcast %cst_9 : f32 to vector<16x100xf32>
    %20 = arith.select %11, %8, %19 : vector<16x100xi1>, vector<16x100xf32>
    %cst_10 = arith.constant dense<0.000000e+00> : vector<16xf32>
    %21 = vector.multi_reduction <add>, %20, %cst_10 [1] : vector<16x100xf32> to vector<16xf32>
    %22 = vector.shape_cast %21 : vector<16xf32> to vector<16x1xf32>
    %cst_11 = arith.constant 1.000000e+00 : f32
    %23 = vector.broadcast %cst_11 : f32 to vector<16x1xf32>
    %24 = arith.maximumf %16, %23 : vector<16x1xf32>
    %cst_12 = arith.constant 1.000000e-01 : f32
    %25 = vector.broadcast %cst_12 : f32 to vector<16x1xf32>
    %26 = arith.divf %25, %24 : vector<16x1xf32>
    %27 = arith.subf %18, %22 : vector<16x1xf32>
    %28 = arith.mulf %26, %27 : vector<16x1xf32>
    %cst_13 = arith.constant 0.899999976 : f32
    %29 = vector.broadcast %cst_13 : f32 to vector<16x1xf32>
    %30 = arith.mulf %29, %22 : vector<16x1xf32>
    %31 = arith.addf %28, %30 : vector<16x1xf32>
    %cst_14 = arith.constant 0.000000e+00 : f32
    %32 = vector.broadcast %cst_14 : f32 to vector<16x1xf32>
    %33 = arith.subf %32, %31 : vector<16x1xf32>
    %34 = tpu.iota {dimensions = array<i32: 0>} : vector<16x1xi32>
    %c1_i32 = arith.constant 1 : i32
    %35 = arith.muli %arg0, %c1_i32 : i32
    %36 = arith.addi %35, %arg1 : i32
    %c16_i32 = arith.constant 16 : i32
    %37 = arith.muli %36, %c16_i32 : i32
    %38 = vector.broadcast %37 : i32 to vector<16x1xi32>
    %39 = arith.addi %38, %34 : vector<16x1xi32>
    %c16_i32_15 = arith.constant 16 : i32
    %40 = vector.broadcast %c16_i32_15 : i32 to vector<16x1xi32>
    %41 = arith.cmpi slt, %39, %40 : vector<16x1xi32>
    %c0_i32_16 = arith.constant 0 : i32
    %42 = vector.broadcast %c0_i32_16 : i32 to vector<16x1xi32>
    %43 = arith.cmpi ne, %4, %42 : vector<16x1xi32>
    %44 = arith.andi %41, %43 : vector<16x1xi1>
    %cst_17 = arith.constant 0.000000e+00 : f32
    %45 = vector.broadcast %cst_17 : f32 to vector<16x1xf32>
    %46 = arith.select %44, %33, %45 : vector<16x1xi1>, vector<16x1xf32>
    %47 = vector.shape_cast %46 : vector<16x1xf32> to vector<1x16x1xf32>
    %cst_18 = arith.constant dense<0.000000e+00> : vector<1xf32>
    %48 = vector.multi_reduction <add>, %47, %cst_18 [1, 2] : vector<1x16x1xf32> to vector<1xf32>
    %49 = vector.shape_cast %48 : vector<1xf32> to vector<1x1x1xf32>
    %50 = vector.extract %49[0, 0, 0] : f32 from vector<1x1x1xf32>
    %cst_19 = arith.constant 1.000000e+00 : f32
    %cst_20 = arith.constant 0.000000e+00 : f32
    %51 = vector.broadcast %cst_19 : f32 to vector<16x1xf32>
    %52 = vector.broadcast %cst_20 : f32 to vector<16x1xf32>
    %53 = arith.select %44, %51, %52 : vector<16x1xi1>, vector<16x1xf32>
    %54 = vector.shape_cast %53 : vector<16x1xf32> to vector<1x16x1xf32>
    %cst_21 = arith.constant dense<0.000000e+00> : vector<1xf32>
    %55 = vector.multi_reduction <add>, %54, %cst_21 [1, 2] : vector<1x16x1xf32> to vector<1xf32>
    %56 = vector.shape_cast %55 : vector<1xf32> to vector<1x1x1xf32>
    %57 = vector.extract %56[0, 0, 0] : f32 from vector<1x1x1xf32>
    %58 = tpu.iota {dimensions = array<i32: 0>} : vector<8x128xi32>
    %59 = tpu.iota {dimensions = array<i32: 1>} : vector<8x128xi32>
    %c0_i32_22 = arith.constant 0 : i32
    %60 = vector.broadcast %c0_i32_22 : i32 to vector<8x128xi32>
    %61 = arith.cmpi eq, %58, %60 : vector<8x128xi32>
    %c0_i32_23 = arith.constant 0 : i32
    %62 = vector.broadcast %c0_i32_23 : i32 to vector<8x128xi32>
    %63 = arith.cmpi eq, %59, %62 : vector<8x128xi32>
    %64 = arith.andi %61, %63 : vector<8x128xi1>
    %c0_i32_24 = arith.constant 0 : i32
    %65 = vector.broadcast %c0_i32_24 : i32 to vector<8x128xi32>
    %66 = arith.cmpi eq, %58, %65 : vector<8x128xi32>
    %c1_i32_25 = arith.constant 1 : i32
    %67 = vector.broadcast %c1_i32_25 : i32 to vector<8x128xi32>
    %68 = arith.cmpi eq, %59, %67 : vector<8x128xi32>
    %69 = arith.andi %66, %68 : vector<8x128xi1>
    %cst_26 = arith.constant 0.000000e+00 : f32
    %70 = vector.broadcast %57 : f32 to vector<8x128xf32>
    %71 = vector.broadcast %cst_26 : f32 to vector<8x128xf32>
    %72 = arith.select %69, %70, %71 : vector<8x128xi1>, vector<8x128xf32>
    %73 = vector.broadcast %50 : f32 to vector<8x128xf32>
    %74 = arith.select %64, %73, %72 : vector<8x128xi1>, vector<8x128xf32>
    %c0_27 = arith.constant 0 : index
    %c0_28 = arith.constant 0 : index
    %75 = vector.load %arg4[%c0_27, %c0_28] : memref<8x128xf32, #tpu.memory_space<vmem>>, vector<8x128xf32>
    %76 = arith.addf %75, %74 : vector<8x128xf32>
    %c0_29 = arith.constant 0 : index
    %c0_30 = arith.constant 0 : index
    %77 = vector.load %arg4[%c0_29, %c0_30] : memref<8x128xf32, #tpu.memory_space<vmem>>, vector<8x128xf32>
    tpu.vector_store %arg4[%c0_29, %c0_30], %76 {strides = array<i32>} : memref<8x128xf32, #tpu.memory_space<vmem>>, vector<8x128xf32>,
    return
  }
  func.func @transform_0(%arg0: i32, %arg1: i32) -> (i32, i32) {
    %c1_i32 = arith.constant 1 : i32
    %0 = arith.muli %arg0, %c1_i32 : i32
    %1 = arith.addi %0, %arg1 : i32
    %c0_i32 = arith.constant 0 : i32
    %c0_i32_0 = arith.constant 0 : i32
    return %1, %c0_i32 : i32, i32
  }
  func.func @transform_1(%arg0: i32, %arg1: i32) -> (i32, i32) {
    %c1_i32 = arith.constant 1 : i32
    %0 = arith.muli %arg0, %c1_i32 : i32
    %1 = arith.addi %0, %arg1 : i32
    %c0_i32 = arith.constant 0 : i32
    %c0_i32_0 = arith.constant 0 : i32
    return %1, %c0_i32 : i32, i32
  }
  func.func @transform_2(%arg0: i32, %arg1: i32) -> (i32, i32) {
    %c0_i32 = arith.constant 0 : i32
    %c0_i32_0 = arith.constant 0 : i32
    return %arg0, %c0_i32 : i32, i32
  }
}

</mosaic_0001>

<bundles_post_ra>
// kernel: tpu_custom_call.1
= control target key start
LH: loop header
LB: loop body
LE: loop exit
PB: predicated region body
PF: predicated region fallthrough
CT: control target
= control target key end

     0   :  { %v238_v2 = vmov 0   ;;  %vm83_vm1 = vcmask 818176   ;;  %s309_s0 = inlined_call_operand.vmem [shape: f32[16,100], index: 0, kind: input, shape index: {}]   ;;  %s310_s1 = inlined_call_operand.vmem [shape: s32[16,1], index: 1, kind: input, shape index: {}]   ;;  %s311_s2 = inlined_call_operand.hbm [shape: f32[8,128], index: 2, kind: output, shape index: {}]  }
   0x1   :  { %v260_v0 = vld [vmem:[%s310_s1] sm:$0xff]  ;;  %209 = vset.pattern.permute.xlu0 %v238_v2  ;;  %v62_v3 = vld [vmem:[%s309_s0 + $0x8] sm:$0xff] }
   0x2   :  { %v61_v1 = vld [vmem:[%s309_s0] sm:$0xff] }
   0x3   :  { %vm65_vm0 = vweird.f32 %v61_v1 }
   0x4   :  { %7 = vsyncpa [#allocation3], 0  ;;  %74 = vperm.xlu0 %209, %v260_v0   ;;  %vm239_vm2 = vmmov 1   ;;  %vm66_vm4 = vweird.f32 %v62_v3  ;;  %v64_v4 = vld [vmem:[%s310_s1 + $0x8] sm:$0xff]  ;;  %v240_v5 = vmov 0.0   ;;  %v71_v14 = vlaneseq  ;;  %s241_s17 = smov [#allocation2]  }
   0x5   :  { %vm67_vm3 = vmxor %vm65_vm0, %vm239_vm2  ;;  %vm130_vm8 = vcmp.ne.s32.totalorder %v260_v0, 0  ;;  %vm131_vm9 = vcmp.ne.s32.totalorder %v64_v4, 0  ;;  %vm136_vm10 = vcmask 7168   ;;  %s181_s18 = sshll.u32 %s241_s17, 4  ;;  %s182_s18 = int_to_ptr.vmem [resolvable:$true] %s181_s18 }
   0x6   :  { %v81_v6 = vsel %vm67_vm3, 1.0, %v240_v5  ;;  %vm68_vm5 = vmxor %vm66_vm4, %vm239_vm2  ;;  %v69_v12 = vsel %vm67_vm3, %v61_v1, 0.0  ;;  %v277_v15 = vand.u32 127, %v71_v14  ;;  %v149_v22 = vsel %vm130_vm8, 1.0, %v240_v5  ;;  %s214_s19 = scalar_lea.vmem %s182_s18, 128  ;;  %p219_p1 = scmp.lt.s32.totalorder %s182_s18, %s182_s18 }
   0x7   :  { %v84_v7 = vsel %vm83_vm1, %v81_v6, 0.0  ;;  %v82_v8 = vsel %vm68_vm5, 1.0, %v240_v5  ;;  %v70_v10 = vsel %vm68_vm5, %v62_v3, 0.0  ;;  %v90_v13 = vsel %vm83_vm1, %v69_v12, 0.0  ;;  %p215_p0 = scmp.ne.s32.totalorder %s182_s18, %s214_s19  ;;  %p220_p2 = scmp.lt.s32.totalorder %s214_s19, %s214_s19 }
   0x8   :  { %85 = vadd.xlane.f32.xlu1 %v84_v7  ;;  %77 = vperm.xlu0 %209, %v64_v4   ;;  %v87_v9 = vsel %vm83_vm1, %v82_v8, 0.0  ;;  %v93_v11 = vsel %vm83_vm1, %v70_v10, 0.0  ;;  %v150_v23 = vsel %vm131_vm9, 1.0, %v240_v5  ;;  %v151_v24 = vsel %vm136_vm10, %v149_v22, 0.0 }
   0x9   :  { %v152_v25 = vsel %vm136_vm10, %v150_v23, 0.0  ;;  %v121_v4 = vshrl.u32 %v71_v14, 7  ;;  %vm166_vm12 = vcmp.eq.s32.totalorder %v277_v15, 1  ;;  %vm164_vm13 = vcmp.eq.s32.totalorder %v277_v15, 0  ;;  %p221_p3 = por %p220_p2, %p219_p1 }
   0xa   :  { %v153_v26 = vadd.f32 %v152_v25, %v151_v24 }
   0xb   :  { %vm163_vm11 = vcmp.eq.s32.totalorder %v121_v4, 0  ;;  %p222_p4 = pnand %p221_p3, %p215_p0 }
   0xc   :  { %88 = vadd.xlane.f32.xlu1 %v87_v9  ;;  %vm167_vm14 = vmand %vm163_vm11, %vm166_vm12 }
   0xd   :  { %vm165_vm15 = vmand %vm163_vm11, %vm164_vm13 }
  0x10   :  { %94 = vadd.xlane.f32.xlu1 %v93_v11 }
  0x27   :  { %91 = vadd.xlane.f32.xlu0 %v90_v13 }
  0x83   :  { %v75_v16 = vpop.permute.xlu0 %74 }
  0x84   :  { %vm79_vm6 = vcmp.eq.s32.totalorder %v277_v15, %v75_v16 }
  0x85   :  { %v96_v17 = vsel %vm79_vm6, %v69_v12, 0.0 }
  0x86   :  { %v98_v18 = vsel %vm83_vm1, %v96_v17, 0.0 }
  0x87   :  { %v78_v19 = vpop.permute.xlu0 %77  ;;  %99 = vadd.xlane.f32.xlu1 %v98_v18 }
  0x88   :  { %vm80_vm7 = vcmp.eq.s32.totalorder %v277_v15, %v78_v19 }
  0x89   :  { %v97_v20 = vsel %vm80_vm7, %v70_v10, 0.0 }
  0x8a   :  { %v101_v21 = vsel %vm83_vm1, %v97_v20, 0.0 }
  0x8b   :  { %102 = vadd.xlane.f32.xlu1 %v101_v21 }
  0x95   :  { %v86_v27 = vpop.xlane.xlu1 %85 }
  0x96   :  { %v104_v28 = vmax.f32 %v86_v27, 1.0 }
  0x98   :  { %210 = vrcp.f32 %v104_v28 }
  0x99   :  { %v89_v29 = vpop.xlane.xlu1 %88 }
  0x9a   :  { %v105_v30 = vmax.f32 %v89_v29, 1.0 }
  0x9c   :  { %212 = vrcp.f32 %v105_v30 }
  0x9d   :  { %v95_v31 = vpop.xlane.xlu1 %94 }
  0xa2   :  { %v211_v32 = vpop.eup %210 }
  0xa3   :  { %v107_v34 = vmul.f32 0.1, %v211_v32 }
  0xa6   :  { %v213_v35 = vpop.eup %212 }
  0xa7   :  { %v109_v38 = vmul.f32 0.1, %v213_v35 }
  0xb4   :  { %v92_v33 = vpop.xlane.xlu0 %91 }
 0x114   :  { %v100_v36 = vpop.xlane.xlu1 %99 }
 0x115   :  { %v110_v37 = vsub.f32 %v92_v33, %v100_v36  ;;  %v114_v40 = vmul.f32 0.9, %v100_v36 }
 0x117   :  { %v112_v39 = vmul.f32 %v110_v37, %v107_v34 }
 0x118   :  { %v103_v41 = vpop.xlane.xlu1 %102 }
 0x119   :  { %v116_v42 = vadd.f32 %v114_v40, %v112_v39  ;;  %v111_v43 = vsub.f32 %v95_v31, %v103_v41  ;;  %v115_v46 = vmul.f32 0.9, %v103_v41 }
 0x11b   :  { %v118_v44 = vsub.f32 0.0, %v116_v42  ;;  %v113_v45 = vmul.f32 %v111_v43, %v109_v38 }
 0x11d   :  { %v117_v47 = vadd.f32 %v115_v46, %v113_v45  ;;  %v134_v49 = vsel %vm130_vm8, %v118_v44, 0.0 }
 0x11e   :  { %v137_v51 = vsel %vm136_vm10, %v134_v49, 0.0 }
 0x11f   :  { %v119_v48 = vsub.f32 0.0, %v117_v47 }
 0x121   :  { %v135_v50 = vsel %vm131_vm9, %v119_v48, 0.0 }
 0x122   :  { %v138_v52 = vsel %vm136_vm10, %v135_v50, 0.0 }
 0x123   :  { %v139_v53 = vadd.f32 %v138_v52, %v137_v51 }
 0x125   :  { %140 = vadd.xlane.f32.xlu1 %v139_v53 }
 0x129   :  { %154 = vadd.xlane.f32.xlu1 %v153_v26 }
 0x1b2   :  { %v141_v54 = vpop.xlane.xlu1 %140 }
 0x1b3   :  { %v142_v55 = vrot.slane %v141_v54, 4 }
 0x1b5   :  { %v143_v56 = vadd.f32 %v142_v55, %v141_v54 }
 0x1b6   :  { %v155_v57 = vpop.xlane.xlu1 %154 }
 0x1b7   :  { %v144_v58 = vrot.slane %v143_v56, 2  ;;  %v156_v59 = vrot.slane %v155_v57, 4 }
 0x1b9   :  { %v157_v60 = vadd.f32 %v156_v59, %v155_v57  ;;  %v145_v61 = vadd.f32 %v144_v58, %v143_v56 }
 0x1bb   :  { %v158_v62 = vrot.slane %v157_v60, 2  ;;  %v146_v63 = vrot.slane %v145_v61, 1 }
 0x1bd   :  { %v159_v0 = vadd.f32 %v158_v62, %v157_v60  ;;  %v147_v1 = vadd.f32 %v146_v63, %v145_v61 }
 0x1bf   :  { %201 = vpush %v147_v1  ;;  %v160_v2 = vrot.slane %v159_v0, 1 }
 0x1c1   :  { %v161_v3 = vadd.f32 %v160_v2, %v159_v0 }
 0x1c3   :  { %203 = vpush %v161_v3 }
 0x1f0   :  { %s202_s0 = spop %201 }
 0x1f1   :  { %v170_v6 = vstv %s202_s0 }
 0x1f4   :  { %s204_s1 = spop %203 }
 0x1f5   :  { %v168_v5 = vstv %s204_s1 }
 0x1f6   :  { %v169_v7 = vsel %vm167_vm14, %v168_v5, 0.0 }
 0x1f7   :  { %v171_v8 = vsel %vm165_vm15, %v170_v6, %v169_v7 }
 0x1f8   :  { %174 = vst [vmem:[#allocation2] sm:$0xff] %v171_v8 }
 0x1f9   :  { %225 = shalt.err (!%p222_p4)
}
 0x1fa   :  { %s226_s22 = scalar_lea.hbm %s311_s2, 128 }
 0x1fb   :  { %p227_p5 = scmp.ne.s32.totalorder %s311_s2, %s226_s22  ;;  %p230_p6 = scmp.lt.u32.totalorder %s226_s22, %s311_s2 }
 0x1fd   :  { %p232_p7 = pnand %p230_p6, %p227_p5 }
 0x1ff   :  { %235 = shalt.err (!%p232_p7)
}
 0x200   :  { %184 = dma.vmem_to_hbm [thread:$0]  %s182_s18, 128, %s311_s2, [#allocation3]  }
 0x201   :  { %236 = dma.done.wait [#allocation3], 128  }
 0x202   :  { %237 = vsyncadd [#allocation3], 4294967168 }
 0x203   :  { %188 = vsyncpa [#allocation3], 1 }

</bundles_post_ra>
